<compile_context>
chip_gen: v6e
topology: v6e:2x2x1
jax: 0.10.0
libtpu: 0.0.40
codegen_flags: <defaults>
</compile_context>

<pallas_src>
import jax
import jax.numpy as jnp
from jax import lax
from jax.experimental import pallas as pl
from jax.experimental.pallas import tpu as pltpu


def _resident_center_kernel(x_ref, ys_ref, invc_ref, center_ref, out_ref):
    """Center table VMEM-resident; per-tile gather via one-hot MXU matmul."""
    tm = x_ref.shape[0]
    c = center_ref.shape[0]

    ys = ys_ref[...]                                          # (TM, 1) int32
    cls_ids = lax.broadcasted_iota(jnp.int32, (tm, c), 1)     # (TM, C)
    onehot = (ys == cls_ids).astype(jnp.float32)              # (TM, C)
    center_exp = jnp.dot(onehot, center_ref[...],
                         preferred_element_type=jnp.float32)  # (TM, F) on MXU

    diff = x_ref[...] - center_exp                            # (TM, F)
    d2 = jnp.sum(diff * diff, axis=-1, keepdims=True)         # (TM, 1)
    partial = jnp.sum(jnp.sqrt(d2) * invc_ref[...])           # scalar
    out_ref[...] = partial.reshape(1, 1, 1)


def _streamed_center_kernel(x_ref, cexp_ref, invc_ref, out_ref):
    """Fallback for large class tables: center[ys] gathered in the wrapper."""
    diff = x_ref[...] - cexp_ref[...]                         # (TM, F)
    d2 = jnp.sum(diff * diff, axis=-1, keepdims=True)         # (TM, 1)
    partial = jnp.sum(jnp.sqrt(d2) * invc_ref[...])
    out_ref[...] = partial.reshape(1, 1, 1)


def center_loss(xs, ys, center, *, max_tile_rows=1024):
    """xs: (B, F) float, ys: (B,) int, center: (C, F) float -> scalar f32."""
    B, F = xs.shape
    C, _ = center.shape

    xs_f = xs.astype(jnp.float32)
    center_f = center.astype(jnp.float32)
    ys_i = ys.astype(jnp.int32)

    # histc(ys, bins=C, 0..C-1) and per-sample 1/count, computed once in XLA.
    count = jnp.zeros((C,), jnp.float32).at[ys_i].add(1.0)
    inv_count = (1.0 / count)[ys_i]                           # (B,) f32

    # Keep the center table VMEM-resident when small (<= 4 MiB raw).
    resident = (C * F * 4) <= (4 << 20)

    # Row-tile size: multiple of 8, capped so double-buffered streams fit
    # comfortably in scoped VMEM on every generation (v5e/v6e/v7x).
    stream_arrays = 1 if resident else 2                      # xs (+ center_exp)
    per_row_stream_bytes = F * 4 * 2 * stream_arrays          # double-buffered
    tm = min(max_tile_rows, max(8, (16 << 20) // max(per_row_stream_bytes, 1)))
    tm = min(tm, ((B + 7) // 8) * 8)
    tm = max(8, (tm // 8) * 8)

    b_pad = pl.cdiv(B, tm) * tm
    num_tiles = b_pad // tm

    ys_p, invc_p = ys_i, inv_count
    if b_pad != B:
        pad = b_pad - B
        xs_f = jnp.pad(xs_f, ((0, pad), (0, 0)))
        ys_p = jnp.pad(ys_p, (0, pad))        # padded labels -> class 0 (valid)
        invc_p = jnp.pad(invc_p, (0, pad))    # padded rows scale by 0 -> no effect

    ys_col = ys_p.reshape(b_pad, 1)
    invc_col = invc_p.reshape(b_pad, 1)

    if resident:
        kernel = _resident_center_kernel
        in_specs = [
            pl.BlockSpec((tm, F), lambda t: (t, 0)),          # xs rows
            pl.BlockSpec((tm, 1), lambda t: (t, 0)),          # labels
            pl.BlockSpec((tm, 1), lambda t: (t, 0)),          # 1/count[ys]
            pl.BlockSpec((C, F), lambda t: (0, 0)),           # resident centers
        ]
        args = (xs_f, ys_col, invc_col, center_f)
    else:
        cexp = center_f[ys_i]                                 # (B, F) XLA gather
        if b_pad != B:
            cexp = jnp.pad(cexp, ((0, b_pad - B), (0, 0)))
        kernel = _streamed_center_kernel
        in_specs = [
            pl.BlockSpec((tm, F), lambda t: (t, 0)),          # xs rows
            pl.BlockSpec((tm, F), lambda t: (t, 0)),          # gathered centers
            pl.BlockSpec((tm, 1), lambda t: (t, 0)),          # 1/count[ys]
        ]
        args = (xs_f, cexp, invc_col)

    partials = pl.pallas_call(
        kernel,
        out_shape=jax.ShapeDtypeStruct((num_tiles, 1, 1), jnp.float32),
        grid=(num_tiles,),
        in_specs=in_specs,
        out_specs=pl.BlockSpec((1, 1, 1), lambda t: (t, 0, 0)),
        compiler_params=pltpu.CompilerParams(
            dimension_semantics=("parallel",),
            vmem_limit_bytes=48 << 20,
        ),
    )(*args)

    return jnp.sum(partials)


def center_loss_ref(xs, ys, center):
    """Pure-JAX reference mirroring the PyTorch forward."""
    ys = ys.astype(jnp.int32)
    center_exp = center[ys].astype(jnp.float32)
    count = jnp.zeros((center.shape[0],), jnp.float32).at[ys].add(1.0)
    count_dis = count[ys]
    d = jnp.sqrt(jnp.sum((xs - center_exp) ** 2, axis=1))
    return jnp.sum(d / count_dis)


if __name__ == "__main__":
    cls_num, feature_num, batch = 4, 32, 8

    key = jax.random.PRNGKey(0)
    k_center, k_xs, k_ys = jax.random.split(key, 3)

    # Deterministic init matching nn.Parameter(torch.randn(cls_num, feature_num))
    center = jax.random.normal(k_center, (cls_num, feature_num), dtype=jnp.float32)
    xs = jax.random.normal(k_xs, (batch, feature_num), dtype=jnp.float32)
    ys = jax.random.randint(k_ys, (batch,), 0, cls_num, dtype=jnp.int32)

    loss = jax.block_until_ready(center_loss(xs, ys, center))
    ref = jax.block_until_ready(center_loss_ref(xs, ys, center))

    assert jnp.allclose(loss, ref, rtol=1e-5, atol=1e-5), (loss, ref)
    print("KERNEL_OK")
</pallas_src>

<mosaic_0001>
module attributes {stable_mosaic.version = 11 : i64} {
  func.func @_resident_center_kernel(%arg0: i32, %arg1: memref<8x32xf32, #tpu.memory_space<vmem>>, %arg2: memref<8x1xi32, #tpu.memory_space<vmem>>, %arg3: memref<8x1xf32, #tpu.memory_space<vmem>>, %arg4: memref<4x32xf32, #tpu.memory_space<vmem>>, %arg5: memref<1x1x1xf32, #tpu.memory_space<vmem>>) attributes {dimension_semantics = [#tpu.dimension_semantics<parallel>], iteration_bounds = array<i64: 1>, scalar_prefetch = 0 : i64, scratch_operands = 0 : i64, tpu.core_type = #tpu.core_type<tc>, window_params = [{transform_indices = @transform_0, window_bounds = array<i64: 8, 32>}, {transform_indices = @transform_1, window_bounds = array<i64: 8, 1>}, {transform_indices = @transform_2, window_bounds = array<i64: 8, 1>}, {pipeline_mode = #tpu.pipeline_mode<synchronous>, transform_indices = @transform_3, window_bounds = array<i64: 4, 32>}, {transform_indices = @transform_4, window_bounds = array<i64: 1, 1, 1>}]} {
    %c0 = arith.constant 0 : index
    %c0_0 = arith.constant 0 : index
    %0 = vector.load %arg2[%c0, %c0_0] : memref<8x1xi32, #tpu.memory_space<vmem>>, vector<8x1xi32>
    %1 = tpu.iota {dimensions = array<i32: 1>} : vector<8x4xi32>
    %2 = vector.broadcast %0 : vector<8x1xi32> to vector<8x4xi32>
    %3 = arith.cmpi eq, %2, %1 : vector<8x4xi32>
    %4 = arith.extui %3 : vector<8x4xi1> to vector<8x4xi32>
    %5 = arith.sitofp %4 : vector<8x4xi32> to vector<8x4xf32>
    %c0_1 = arith.constant 0 : index
    %c0_2 = arith.constant 0 : index
    %6 = vector.load %arg4[%c0_1, %c0_2] : memref<4x32xf32, #tpu.memory_space<vmem>>, vector<4x32xf32>
    %cst = arith.constant dense<0.000000e+00> : vector<8x32xf32>
    %7 = tpu.matmul %5, %6, %cst {dimension_numbers = #tpu.dot_dimension_numbers<[1], [0], [0], [1], [0, 0, 1, 1], [], []>} : vector<8x4xf32>, vector<4x32xf32>, vector<8x32xf32> -> vector<8x32xf32>
    %c0_3 = arith.constant 0 : index
    %c0_4 = arith.constant 0 : index
    %8 = vector.load %arg1[%c0_3, %c0_4] : memref<8x32xf32, #tpu.memory_space<vmem>>, vector<8x32xf32>
    %9 = arith.subf %8, %7 : vector<8x32xf32>
    %10 = arith.mulf %9, %9 : vector<8x32xf32>
    %cst_5 = arith.constant dense<0.000000e+00> : vector<8xf32>
    %11 = vector.multi_reduction <add>, %10, %cst_5 [1] : vector<8x32xf32> to vector<8xf32>
    %12 = vector.shape_cast %11 : vector<8xf32> to vector<8x1xf32>
    %13 = math.sqrt %12 : vector<8x1xf32>
    %c0_6 = arith.constant 0 : index
    %c0_7 = arith.constant 0 : index
    %14 = vector.load %arg3[%c0_6, %c0_7] : memref<8x1xf32, #tpu.memory_space<vmem>>, vector<8x1xf32>
    %15 = arith.mulf %13, %14 : vector<8x1xf32>
    %16 = vector.shape_cast %15 : vector<8x1xf32> to vector<1x8x1xf32>
    %cst_8 = arith.constant dense<0.000000e+00> : vector<1xf32>
    %17 = vector.multi_reduction <add>, %16, %cst_8 [1, 2] : vector<1x8x1xf32> to vector<1xf32>
    %18 = vector.shape_cast %17 : vector<1xf32> to vector<1x1x1xf32>
    %19 = vector.extract %18[0, 0, 0] : f32 from vector<1x1x1xf32>
    %20 = vector.broadcast %19 : f32 to vector<1x1x1xf32>
    %c0_9 = arith.constant 0 : index
    %c0_10 = arith.constant 0 : index
    %c0_11 = arith.constant 0 : index
    %21 = vector.load %arg5[%c0_9, %c0_10, %c0_11] : memref<1x1x1xf32, #tpu.memory_space<vmem>>, vector<1x1x1xf32>
    tpu.vector_store %arg5[%c0_9, %c0_10, %c0_11], %20 {strides = array<i32>} : memref<1x1x1xf32, #tpu.memory_space<vmem>>, vector<1x1x1xf32>,
    return
  }
  func.func @transform_0(%arg0: i32) -> (i32, i32) {
    %c0_i32 = arith.constant 0 : i32
    %c0_i32_0 = arith.constant 0 : i32
    return %arg0, %c0_i32 : i32, i32
  }
  func.func @transform_1(%arg0: i32) -> (i32, i32) {
    %c0_i32 = arith.constant 0 : i32
    %c0_i32_0 = arith.constant 0 : i32
    return %arg0, %c0_i32 : i32, i32
  }
  func.func @transform_2(%arg0: i32) -> (i32, i32) {
    %c0_i32 = arith.constant 0 : i32
    %c0_i32_0 = arith.constant 0 : i32
    return %arg0, %c0_i32 : i32, i32
  }
  func.func @transform_3(%arg0: i32) -> (i32, i32) {
    %c0_i32 = arith.constant 0 : i32
    %c0_i32_0 = arith.constant 0 : i32
    %c0_i32_1 = arith.constant 0 : i32
    return %c0_i32, %c0_i32_0 : i32, i32
  }
  func.func @transform_4(%arg0: i32) -> (i32, i32, i32) {
    %c0_i32 = arith.constant 0 : i32
    %c0_i32_0 = arith.constant 0 : i32
    %c0_i32_1 = arith.constant 0 : i32
    return %arg0, %c0_i32, %c0_i32_0 : i32, i32, i32
  }
}

</mosaic_0001>

<bundles_post_ra>
// kernel: tpu_custom_call.1
= control target key start
LH: loop header
LB: loop body
LE: loop exit
PB: predicated region body
PF: predicated region fallthrough
CT: control target
= control target key end

     0   :  { %vm32_vm0 = vcmask 1043456   ;;  %v191_v2 = vmov 0   ;;  %v192_v3 = vmov 0.0   ;;  %s235_s0 = inlined_call_operand.vmem [shape: f32[8,32], index: 0, kind: input, shape index: {}]   ;;  %s236_s1 = inlined_call_operand.vmem [shape: s32[8,1], index: 1, kind: input, shape index: {}]   ;;  %s237_s2 = inlined_call_operand.vmem [shape: f32[8,1], index: 2, kind: input, shape index: {}]   ;;  %s238_s3 = inlined_call_operand.vmem [shape: f32[4,32], index: 3, kind: input, shape index: {}]   ;;  %s239_s4 = inlined_call_operand.hbm [shape: f32[1,1,1], index: 4, kind: output, shape index: {}]  }
   0x1   :  { %v18_v0 = vld [vmem:[%s236_s1] sm:$0xff]  ;;  %166 = vset.pattern.permute.xlu0 %v191_v2  ;;  %155 = vmatprep.subr.mxu0 %v192_v3 }
   0x2   :  { %v27_v1 = vld [vmem:[%s238_s3] sm:$0xf] }
   0x3   :  { %9 = vsyncpa [#allocation3], 0  ;;  %22 = vperm.xlu0 %166, %v18_v0   ;;  %156 = vmatpush3.msk.msra.mxu0 %vm32_vm0, %v27_v1  ;;  %vm193_vm1 = vmmov 0   ;;  %v19_v4 = vlaneseq  ;;  %vm28_vm2 = vcmask 31744   ;;  %v106_v8 = vld [vmem:[%s235_s0] sm:$0xff]  ;;  %vm109_vm4 = vcmask 261120  }
   0x4   :  { %157 = vmatprep.mubr.msk.f32.mxu0 %vm193_vm1, %v192_v3  ;;  %v120_v18 = vld [vmem:[%s237_s2] sm:$0xff]  ;;  %vm122_vm7 = vcmask 7168   ;;  %s194_s0 = smov [#allocation2]   ;;  %vm134_vm8 = vcmask 0  }
   0x5   :  { %v20_v5 = vand.u32 127, %v19_v4  ;;  %s142_s21 = sshll.u32 %s194_s0, 4  ;;  %s143_s21 = int_to_ptr.vmem [resolvable:$true] %s142_s21 }
   0x6   :  { %s169_s2 = scalar_lea.vmem %s143_s21, 16  ;;  %s173_s23 = scalar_lea.vmem %s143_s21, 32 }
   0x7   :  { %p170_p0 = scmp.ne.s32.totalorder %s143_s21, %s169_s2  ;;  %p174_p1 = scmp.lt.s32.totalorder %s143_s21, %s143_s21 }
   0x8   :  { %p175_p2 = scmp.lt.s32.totalorder %s173_s23, %s169_s2 }
   0xa   :  { %p176_p3 = por %p175_p2, %p174_p1 }
   0xc   :  { %p177_p4 = pnand %p176_p3, %p170_p0 }
  0x7e   :  { %v23_v6 = vpop.permute.xlu0 %22 }
  0x7f   :  { %vm24_vm3 = vcmp.eq.s32.totalorder %v23_v6, %v20_v5 }
  0x80   :  { %v150_v7 = vsel %vm24_vm3, 1.0, %v192_v3 }
  0x81   :  { %158 = vmatmul.mubr.msk.f32.vlgmr.msra.gmra.mxu0 %vm28_vm2, %v150_v7 }
 0x141   :  { %v102_v9 = vpop.f32.mrf.mxu0 }
 0x142   :  { %v107_v10 = vsub.f32 %v106_v8, %v102_v9 }
 0x143   :  { %v159_v11 = vpop.f32.mrf.mxu0 }
 0x144   :  { %v108_v12 = vmul.f32 %v107_v10, %v107_v10 }
 0x146   :  { %v110_v13 = vsel %vm109_vm4, %v108_v12, 0.0 }
 0x147   :  { %111 = vadd.xlane.f32.xlu0 %v110_v13 }
 0x1d0   :  { %v112_v14 = vpop.xlane.xlu0 %111 }
 0x1d1   :  { %167 = vrsqrt.f32 %v112_v14  ;;  %vm115_vm5 = vcmp.eq.f32.partialorder %v112_v14, inf  ;;  %v118_v17 = vand.u32 2147483648, %v112_v14  ;;  %vm117_vm6 = vcmp.eq.f32.partialorder %v112_v14, 0.0 }
 0x1de   :  { %v168_v15 = vpop.eup %167 }
 0x1df   :  { %v114_v16 = vmul.f32 %v168_v15, %v112_v14 }
 0x1e1   :  { %v116_v19 = vsel %vm115_vm5, %v112_v14, %v114_v16 }
 0x1e2   :  { %v119_v20 = vsel %vm117_vm6, %v118_v17, %v116_v19 }
 0x1e3   :  { %v121_v21 = vmul.f32 %v120_v18, %v119_v20 }
 0x1e5   :  { %v123_v22 = vsel %vm122_vm7, %v121_v21, 0.0 }
 0x1e6   :  { %124 = vadd.xlane.f32.xlu1 %v123_v22 }
 0x26f   :  { %v125_v23 = vpop.xlane.xlu1 %124 }
 0x270   :  { %v126_v24 = vrot.slane %v125_v23, 4 }
 0x272   :  { %v127_v25 = vadd.f32 %v126_v24, %v125_v23 }
 0x274   :  { %v128_v26 = vrot.slane %v127_v25, 2 }
 0x276   :  { %v129_v27 = vadd.f32 %v128_v26, %v127_v25 }
 0x278   :  { %v130_v28 = vrot.slane %v129_v27, 1 }
 0x27a   :  { %v131_v29 = vadd.f32 %v130_v28, %v129_v27 }
 0x27c   :  { %160 = vpush %v131_v29 }
 0x2ad   :  { %s161_s22 = spop %160 }
 0x2ae   :  { %v133_v30 = vstv %s161_s22 }
 0x2af   :  { %135 = vst.msk [vmem:[#allocation2] sm:$0x1] %vm134_vm8, %v133_v30 }
 0x2b0   :  { %180 = shalt.err (!%p177_p4)
}
 0x2b1   :  { %145 = dma.vmem_to_hbm [thread:$0]  %s143_s21, 16, %s239_s4, [#allocation3]  }
 0x2b2   :  { %189 = dma.done.wait [#allocation3], 16  }
 0x2b3   :  { %190 = vsyncadd [#allocation3], 4294967280 }
 0x2b4   :  { %149 = vsyncpa [#allocation3], 1 }

</bundles_post_ra>
